<compile_context>
chip_gen: v5e
topology: v5e:2x2
jax: 0.10.0
libtpu: 0.0.40
codegen_flags: <defaults>
</compile_context>

<pallas_src>
import functools
import math

import jax
import jax.numpy as jnp
from jax.experimental import pallas as pl
from jax.experimental.pallas import tpu as pltpu


# ---------------------------------------------------------------------------
# Kernel 1: row-tiled lane-dense matmul  y = x @ w   (bf16 operands, f32 accum)
# Used for the block-diagonal q/k/v projections.
# ---------------------------------------------------------------------------
def _matmul_kernel(x_ref, w_ref, o_ref):
    o_ref[...] = jnp.dot(x_ref[...], w_ref[...],
                         preferred_element_type=jnp.float32).astype(o_ref.dtype)


def _pick_tile(length, preferred):
    """Largest TPU-friendly tile <= preferred that divides `length`, else full length."""
    if length <= preferred:
        return length
    for t in (preferred, 512, 384, 256, 128):
        if t <= preferred and length % t == 0:
            return t
    return length


def _project(x2d, w_t, out_dtype=jnp.bfloat16, preferred_tile=256):
    rows, k = x2d.shape
    n = w_t.shape[1]
    tm = _pick_tile(rows, preferred_tile)
    return pl.pallas_call(
        _matmul_kernel,
        out_shape=jax.ShapeDtypeStruct((rows, n), out_dtype),
        grid=(rows // tm,),
        in_specs=[pl.BlockSpec((tm, k), lambda i: (i, 0)),
                  pl.BlockSpec((k, n), lambda i: (0, 0))],
        out_specs=pl.BlockSpec((tm, n), lambda i: (i, 0)),
        compiler_params=pltpu.CompilerParams(dimension_semantics=("parallel",)),
    )(x2d, w_t)


# ---------------------------------------------------------------------------
# Kernel 2: flash-style multi-head attention with fused fc_out.
# One grid step = one (batch, q-tile, k-tile); heads stay fused in the lane dim.
# ---------------------------------------------------------------------------
def _mha_flash_kernel(qp_ref, kp_ref, vp_ref, bias_ref, wfc_ref, o_ref,
                      m_sc, l_sc, acc_sc, *, heads):
    """
    qp_ref  : (1, TQ, E)  bf16  pre-projected queries (1/sqrt(E) folded in)
    kp_ref  : (1, TK, E)  bf16  pre-projected keys
    vp_ref  : (1, TK, E)  bf16  pre-projected values
    bias_ref: (1, TQ, TK) f32   additive mask bias (0 or -1e20), shared by all heads
    wfc_ref : (E, E)      bf16  fc_out weight, pre-transposed
    o_ref   : (1, TQ, E)  f32   output, written on the last k-tile
    m/l/acc : f32 VMEM scratch, resident across the k-tile ("arbitrary") axis
    """
    ki = pl.program_id(2)
    nk = pl.num_programs(2)

    @pl.when(ki == 0)
    def _init():
        m_sc[...] = jnp.full_like(m_sc, -jnp.inf)
        l_sc[...] = jnp.zeros_like(l_sc)
        acc_sc[...] = jnp.zeros_like(acc_sc)

    tq, e = qp_ref.shape[1], qp_ref.shape[2]
    tk = kp_ref.shape[1]
    d = e // heads

    # (T, E) -> (H, T, D): split heads out of the lane dim on small VMEM tiles.
    qh = qp_ref[0].reshape(tq, heads, d).transpose(1, 0, 2)   # (H, TQ, D) bf16
    kh = kp_ref[0].reshape(tk, heads, d).transpose(1, 0, 2)   # (H, TK, D) bf16
    vh = vp_ref[0].reshape(tk, heads, d).transpose(1, 0, 2)   # (H, TK, D) bf16

    # energy[h, q, k] = sum_d qh * kh  (softmax scale already folded into Wq)
    s = jnp.einsum("hqd,hkd->hqk", qh, kh,
                   preferred_element_type=jnp.float32)        # (H, TQ, TK) f32
    s = s + bias_ref[...]                                      # additive mask bias

    m_prev = m_sc[...]                                         # (H, TQ, 1)
    m_new = jnp.maximum(m_prev, jnp.max(s, axis=-1, keepdims=True))
    alpha = jnp.exp(m_prev - m_new)
    p = jnp.exp(s - m_new)                                     # (H, TQ, TK) f32
    l_sc[...] = alpha * l_sc[...] + jnp.sum(p, axis=-1, keepdims=True)
    pv = jnp.einsum("hqk,hkd->hqd", p.astype(jnp.bfloat16), vh,
                    preferred_element_type=jnp.float32)        # (H, TQ, D) f32
    acc_sc[...] = alpha * acc_sc[...] + pv
    m_sc[...] = m_new

    @pl.when(ki == nk - 1)
    def _finalize():
        out_h = acc_sc[...] * pl.reciprocal(l_sc[...], approx=True)   # (H, TQ, D)
        concat = out_h.transpose(1, 0, 2).reshape(tq, e)              # (TQ, E)
        o_ref[0] = jnp.dot(concat.astype(jnp.bfloat16), wfc_ref[...],
                           preferred_element_type=jnp.float32).astype(o_ref.dtype)


# ---------------------------------------------------------------------------
# Host wrapper
# ---------------------------------------------------------------------------
def self_attention(values, keys, query, mask, params, *, emb_size, heads):
    wq, wk, wv, w_fc = params["wq"], params["wk"], params["wv"], params["w_fc"]
    N, Lq, E = query.shape
    Lk = keys.shape[1]
    Lv = values.shape[1]
    D = E // heads
    assert D * heads == E and Lk == Lv

    # Block-diagonal (E, E) projections: applying the shared per-head (D, D) Linear to
    # every head is x @ kron(I_heads, W.T). Fold 1/sqrt(emb_size) into Wq so no
    # per-(Lq, Lk) scaling pass is needed in the kernel.
    scale = 1.0 / math.sqrt(float(emb_size))
    eye_h = jnp.eye(heads, dtype=jnp.float32)
    wq_blk = jnp.kron(eye_h, wq.T * scale).astype(jnp.bfloat16)
    wk_blk = jnp.kron(eye_h, wk.T).astype(jnp.bfloat16)
    wv_blk = jnp.kron(eye_h, wv.T).astype(jnp.bfloat16)
    wfc_t = w_fc.T.astype(jnp.bfloat16)

    # Lane-dense projections: (N*L, E) @ (E, E), bf16 operands, f32 accumulation.
    qp = _project(query.astype(jnp.bfloat16).reshape(N * Lq, E), wq_blk).reshape(N, Lq, E)
    kp = _project(keys.astype(jnp.bfloat16).reshape(N * Lk, E), wk_blk).reshape(N, Lk, E)
    vp = _project(values.astype(jnp.bfloat16).reshape(N * Lv, E), wv_blk).reshape(N, Lv, E)

    # Additive mask bias shared across heads: 0 where visible, -1e20 where masked.
    if mask is None:
        bias = jnp.zeros((N, Lq, Lk), jnp.float32)
    else:
        bias = jnp.where(mask.reshape(N, Lq, Lk) == 0,
                         jnp.float32(-1e20), jnp.float32(0.0))

    # Tile caps chosen so bf16 K/V + f32 scratch fit comfortably in v7x's 64 MiB VMEM.
    tq = _pick_tile(Lq, 256)
    tk = _pick_tile(Lk, 256)
    grid = (N, Lq // tq, Lk // tk)

    kern = functools.partial(_mha_flash_kernel, heads=heads)
    out = pl.pallas_call(
        kern,
        out_shape=jax.ShapeDtypeStruct((N, Lq, E), jnp.float32),
        grid=grid,
        in_specs=[
            pl.BlockSpec((1, tq, E), lambda n, qi, ki: (n, qi, 0)),
            pl.BlockSpec((1, tk, E), lambda n, qi, ki: (n, ki, 0)),
            pl.BlockSpec((1, tk, E), lambda n, qi, ki: (n, ki, 0)),
            pl.BlockSpec((1, tq, tk), lambda n, qi, ki: (n, qi, ki)),
            pl.BlockSpec((E, E), lambda n, qi, ki: (0, 0)),
        ],
        out_specs=pl.BlockSpec((1, tq, E), lambda n, qi, ki: (n, qi, 0)),
        scratch_shapes=[
            pltpu.VMEM((heads, tq, 1), jnp.float32),   # m (running max)
            pltpu.VMEM((heads, tq, 1), jnp.float32),   # l (running denom)
            pltpu.VMEM((heads, tq, D), jnp.float32),   # acc (running numerator)
        ],
        compiler_params=pltpu.CompilerParams(
            dimension_semantics=("parallel", "parallel", "arbitrary")),
    )(qp, kp, vp, bias, wfc_t)
    return out


def self_attention_ref(values, keys, query, mask, params, *, emb_size, heads):
    """Pure-JAX f32 reference of the intended forward."""
    wq, wk, wv, w_fc = params["wq"], params["wk"], params["wv"], params["w_fc"]
    N, Lq, E = query.shape
    D = E // heads
    q = query.reshape(N, Lq, heads, D) @ wq.T
    k = keys.reshape(N, keys.shape[1], heads, D) @ wk.T
    v = values.reshape(N, values.shape[1], heads, D) @ wv.T
    energy = jnp.einsum("nqhd,nkhd->nhqk", q, k)
    if mask is not None:
        energy = jnp.where(mask == 0, -1e20, energy)
    attn = jax.nn.softmax(energy / math.sqrt(float(emb_size)), axis=3)
    out = jnp.einsum("nhqk,nkhd->nqhd", attn, v).reshape(N, Lq, E)
    return out @ w_fc.T


if __name__ == "__main__":
    emb_size, heads = 32, 4
    head_dim = emb_size // heads
    N, seq = 2, 8

    key = jax.random.PRNGKey(0)
    k_v, k_k, k_q, k_wq, k_wk, k_wv, k_fc = jax.random.split(key, 7)

    values = jax.random.normal(k_v, (N, seq, emb_size), dtype=jnp.float32)
    keys_in = jax.random.normal(k_k, (N, seq, emb_size), dtype=jnp.float32)
    query = jax.random.normal(k_q, (N, seq, emb_size), dtype=jnp.float32)

    # (N, 1, Lq, Lk) causal mask, broadcast over heads.
    mask = jnp.broadcast_to(
        jnp.tril(jnp.ones((seq, seq), dtype=jnp.int32))[None, None],
        (N, 1, seq, seq)).astype(jnp.int32)

    # Deterministic params matching nn.Linear weight shapes (out, in), bias=False.
    scale_h = 1.0 / math.sqrt(head_dim)
    scale_e = 1.0 / math.sqrt(emb_size)
    params = {
        "wq": jax.random.uniform(k_wq, (head_dim, head_dim), jnp.float32, -scale_h, scale_h),
        "wk": jax.random.uniform(k_wk, (head_dim, head_dim), jnp.float32, -scale_h, scale_h),
        "wv": jax.random.uniform(k_wv, (head_dim, head_dim), jnp.float32, -scale_h, scale_h),
        "w_fc": jax.random.uniform(k_fc, (emb_size, emb_size), jnp.float32, -scale_e, scale_e),
    }

    out = self_attention(values, keys_in, query, mask, params,
                         emb_size=emb_size, heads=heads)
    out = jax.block_until_ready(out)

    ref = self_attention_ref(values, keys_in, query, mask, params,
                             emb_size=emb_size, heads=heads)
    assert out.shape == (N, seq, emb_size)
    # bf16 matmul operands -> looser tolerance vs the f32 reference.
    assert jnp.allclose(out, ref, atol=5e-2, rtol=5e-2), "mismatch vs JAX reference"

    print("KERNEL_OK")
</pallas_src>

<mosaic_0001>
module attributes {stable_mosaic.version = 11 : i64} {
  func.func @_matmul_kernel(%arg0: i32, %arg1: memref<16x32xbf16, #tpu.memory_space<vmem>>, %arg2: memref<32x32xbf16, #tpu.memory_space<vmem>>, %arg3: memref<16x32xbf16, #tpu.memory_space<vmem>>) attributes {dimension_semantics = [#tpu.dimension_semantics<parallel>], iteration_bounds = array<i64: 1>, scalar_prefetch = 0 : i64, scratch_operands = 0 : i64, tpu.core_type = #tpu.core_type<tc>, window_params = [{transform_indices = @transform_0, window_bounds = array<i64: 16, 32>}, {pipeline_mode = #tpu.pipeline_mode<synchronous>, transform_indices = @transform_1, window_bounds = array<i64: 32, 32>}, {transform_indices = @transform_2, window_bounds = array<i64: 16, 32>}]} {
    %c0 = arith.constant 0 : index
    %c0_0 = arith.constant 0 : index
    %0 = vector.load %arg1[%c0, %c0_0] : memref<16x32xbf16, #tpu.memory_space<vmem>>, vector<16x32xbf16>
    %c0_1 = arith.constant 0 : index
    %c0_2 = arith.constant 0 : index
    %1 = vector.load %arg2[%c0_1, %c0_2] : memref<32x32xbf16, #tpu.memory_space<vmem>>, vector<32x32xbf16>
    %cst = arith.constant dense<0.000000e+00> : vector<16x32xf32>
    %2 = tpu.matmul %0, %1, %cst {dimension_numbers = #tpu.dot_dimension_numbers<[1], [0], [0], [1], [0, 0, 1, 1], [], []>} : vector<16x32xbf16>, vector<32x32xbf16>, vector<16x32xf32> -> vector<16x32xf32>
    %3 = arith.truncf %2 : vector<16x32xf32> to vector<16x32xbf16>
    %c0_3 = arith.constant 0 : index
    %c0_4 = arith.constant 0 : index
    %4 = vector.load %arg3[%c0_3, %c0_4] : memref<16x32xbf16, #tpu.memory_space<vmem>>, vector<16x32xbf16>
    tpu.vector_store %arg3[%c0_3, %c0_4], %3 {strides = array<i32>} : memref<16x32xbf16, #tpu.memory_space<vmem>>, vector<16x32xbf16>,
    return
  }
  func.func @transform_0(%arg0: i32) -> (i32, i32) {
    %c0_i32 = arith.constant 0 : i32
    %c0_i32_0 = arith.constant 0 : i32
    return %arg0, %c0_i32 : i32, i32
  }
  func.func @transform_1(%arg0: i32) -> (i32, i32) {
    %c0_i32 = arith.constant 0 : i32
    %c0_i32_0 = arith.constant 0 : i32
    %c0_i32_1 = arith.constant 0 : i32
    return %c0_i32, %c0_i32_0 : i32, i32
  }
  func.func @transform_2(%arg0: i32) -> (i32, i32) {
    %c0_i32 = arith.constant 0 : i32
    %c0_i32_0 = arith.constant 0 : i32
    return %arg0, %c0_i32 : i32, i32
  }
}

</mosaic_0001>

<bundles_post_ra>
// kernel: tpu_custom_call.1
= control target key start
LH: loop header
LB: loop body
LE: loop exit
PB: predicated region body
PF: predicated region fallthrough
CT: control target
= control target key end

     0   :  { %7 = vsyncpa [#allocation3], 0  ;;  %s248_s0 = inlined_call_operand.hbm [shape: bf16[16,32], index: 0, kind: input, shape index: {}]   ;;  %s249_s1 = inlined_call_operand.hbm [shape: bf16[32,32], index: 1, kind: input, shape index: {}]   ;;  %s250_s2 = inlined_call_operand.hbm [shape: bf16[16,32], index: 2, kind: output, shape index: {}]  }
   0x1   :  { %8 = vsyncpa [#allocation6], 0 }
   0x2   :  { %9 = vsyncpa [#allocation4], 0  ;;  %s14_s11 = sshll.u32 %s248_s0, 4  ;;  %s210_s12 = smov [#allocation2]   ;;  %s15_s11 = int_to_ptr.hbm [resolvable:$true] %s14_s11 }
   0x3   :  { %s16_s13 = sshll.u32 %s210_s12, 4  ;;  %s27_s16 = sshll.u32 %s249_s1, 4  ;;  %s17_s13 = int_to_ptr.vmem [resolvable:$true] %s16_s13  ;;  %s28_s16 = int_to_ptr.hbm [resolvable:$true] %s27_s16 }
   0x4   :  { %s211_s17 = smov 64   ;;  %s212_s18 = smov 4  }
   0x5   :  { %22 = dma.hbm_to_vmem [thread:$0]  %s15_s11, 128, %s17_s13, [#allocation3], %s211_s17, %s211_s17, %s212_s18  }
   0x6   :  { %s213_s19 = smov [#allocation5]  }
   0x7   :  { %s29_s20 = sshll.u32 %s213_s19, 4  ;;  %s30_s20 = int_to_ptr.vmem [resolvable:$true] %s29_s20 }
   0x8   :  { %35 = dma.hbm_to_vmem [thread:$0]  %s28_s16, 256, %s30_s20, [#allocation6], %s211_s17, %s211_s17, %s212_s18  }
   0x9   :  { %204 = dma.done.wait [#allocation3], 128  }
   0xa   :  { %205 = vsyncadd [#allocation3], 4294967168 }
   0xb   :  { %206 = dma.done.wait [#allocation6], 256  }
   0xc   :  { %207 = vsyncadd [#allocation6], 4294967040  ;;  %v126_v0 = vld [vmem:[#allocation5 + $0x8] sm:$0xff]  ;;  %v125_v1 = vld [vmem:[#allocation5] sm:$0xff]  ;;  %vm68_vm0 = vcmask 261120   ;;  %vm88_vm1 = vcmask 257024  }
   0xd   :  { %78 = vmatpush.bf16.msra.mxu0 %v126_v0  ;;  %v124_v2 = vld [vmem:[#allocation2] sm:$0xff]  ;;  %s214_s0 = smov [#allocation7]   ;;  %s97_s23 = sshll.u32 %s250_s2, 4  ;;  %s98_s23 = int_to_ptr.hbm [resolvable:$true] %s97_s23 }
   0xe   :  { %s95_s1 = sshll.u32 %s214_s0, 4  ;;  %s96_s1 = int_to_ptr.vmem [resolvable:$true] %s95_s1 }
  0x11   :  { %79 = vmatpush.bf16.msra.mxu0 %v125_v1 }
  0x14   :  { %123 = vmatmul.msk.bf16.vlgmr.msra.gmra.mxu0 %vm68_vm0, %v124_v2 }
  0x91   :  { %v81_v3 = vpop.f32.mrf.mxu0 }
  0x92   :  { %v86_v4 = vpack.c.bf16 %v81_v3, %v81_v3 }
  0x94   :  { %89 = vst.msk [vmem:[#allocation7] sm:$0xf] %vm88_vm1, %v86_v4 }
  0x99   :  { %v83_v5 = vpop.f32.mrf.mxu0 }
  0x9a   :  { %v87_v6 = vpack.c.bf16 %v83_v5, %v83_v5 }
  0x9c   :  { %90 = vst.msk [vmem:[#allocation7 + $0x4] sm:$0xf] %vm88_vm1, %v87_v6 }
  0x9d   :  { %103 = dma.vmem_to_hbm [thread:$0]  %s96_s1, 128, %s98_s23, [#allocation4], %s211_s17, %s211_s17, %s212_s18  }
  0x9e   :  { %208 = dma.done.wait [#allocation4], 128  }
  0x9f   :  { %209 = vsyncadd [#allocation4], 4294967168 }
  0xa0   :  { %108 = vsyncpa [#allocation3], 1 }
  0xa1   :  { %109 = vsyncpa [#allocation6], 1 }
  0xa2   :  { %110 = vsyncpa [#allocation4], 1 }

</bundles_post_ra>
